<compile_context>
chip_gen: v7x
topology: tpu7x:2x2x1
jax: 0.10.0
libtpu: 0.0.40
codegen_flags: <defaults>
</compile_context>

<pallas_src>
import math
from functools import partial

import jax
import jax.numpy as jnp
from jax.experimental import pallas as pl
from jax.experimental.pallas import tpu as pltpu


def _round_up(x, m):
    return ((x + m - 1) // m) * m


def posemb_kernel(x_ref, wfull_ref, o_ref, *, half_dim):
    # x_ref:     (tb, 1)        timestep column
    # wfull_ref: (1, dim+1)     [0, w_0..w_{hd-1}, w_0..w_{hd-1}]
    # o_ref:     (tb, dim+1)
    x = x_ref[...].astype(jnp.float32)                      # (tb, 1)
    wf = wfull_ref[...].astype(jnp.float32)                 # (1, dim+1)
    freqs = x * wf * (2.0 * math.pi)                        # (tb, dim+1) broadcast
    s = jnp.sin(freqs)
    c = jnp.cos(freqs)
    col = jax.lax.broadcasted_iota(jnp.int32, freqs.shape, 1)
    sincos = jnp.where(col <= half_dim, s, c)               # cols 1..hd -> sin, rest -> cos
    out = jnp.where(col == 0, x, sincos)                    # col 0 -> raw x
    o_ref[...] = out.astype(o_ref.dtype)


def random_or_learned_sinusoidal_pos_emb(x, weights, *, tb=None):
    """Pallas forward of RandomOrLearnedSinusoidalPosEmb.

    x:       (B,)        float timesteps
    weights: (half_dim,) frequency weights (random or learned — same forward)
    returns: (B, 2*half_dim + 1)
    """
    B = x.shape[0]
    half_dim = weights.shape[0]
    out_dim = 2 * half_dim + 1
    dtype = x.dtype
    itemsize = jnp.dtype(dtype).itemsize

    # Tile over batch; keep sublane-aligned and handle ragged B by padding.
    if tb is None:
        tb = min(512, _round_up(B, 8))
    n_tiles = pl.cdiv(B, tb)
    Bp = n_tiles * tb

    x2 = x.reshape(B, 1)
    if Bp != B:
        x2 = jnp.pad(x2, ((0, Bp - B), (0, 0)))

    # Pre-built frequency row: column 0 is a dummy 0 (that column outputs raw x).
    w_full = jnp.concatenate(
        [jnp.zeros((1,), dtype=weights.dtype), weights, weights]
    ).reshape(1, out_dim)

    out = pl.pallas_call(
        partial(posemb_kernel, half_dim=half_dim),
        out_shape=jax.ShapeDtypeStruct((Bp, out_dim), dtype),
        grid_spec=pltpu.PrefetchScalarGridSpec(
            num_scalar_prefetch=0,
            grid=(n_tiles,),
            in_specs=[
                pl.BlockSpec((tb, 1), lambda i: (i, 0)),          # x column (tiled over B)
                pl.BlockSpec((1, out_dim), lambda i: (0, 0)),     # w_full (resident)
            ],
            out_specs=pl.BlockSpec((tb, out_dim), lambda i: (i, 0)),
        ),
        compiler_params=pltpu.CompilerParams(
            dimension_semantics=("parallel",),
        ),
        cost_estimate=pl.CostEstimate(
            flops=3 * Bp * out_dim,
            transcendentals=2 * Bp * out_dim,
            bytes_accessed=(Bp + out_dim + Bp * out_dim) * itemsize,
        ),
    )(x2, w_full)

    return out[:B]


if __name__ == "__main__":
    key = jax.random.PRNGKey(0)
    kx, kw = jax.random.split(key)

    B = 8            # batch of timesteps
    dim = 16         # embedding dim (must be even); output is dim + 1
    half_dim = dim // 2

    # Diffusion-style timesteps in [0, 1) and random frequency weights.
    x = jax.random.uniform(kx, (B,), dtype=jnp.float32)
    weights = jax.random.normal(kw, (half_dim,), dtype=jnp.float32)

    out = random_or_learned_sinusoidal_pos_emb(x, weights)
    out = jax.block_until_ready(out)

    # Reference: exact PyTorch forward semantics in plain JAX.
    xr = x[:, None]
    freqs = xr * weights[None, :] * 2.0 * math.pi
    ref = jnp.concatenate([xr, jnp.sin(freqs), jnp.cos(freqs)], axis=-1)

    assert out.shape == (B, dim + 1) and out.dtype == x.dtype
    assert jnp.allclose(out, ref, atol=1e-5, rtol=1e-5), "mismatch vs reference"

    print("KERNEL_OK")
</pallas_src>

<mosaic_0001>
module attributes {stable_mosaic.version = 11 : i64} {
  func.func @posemb_kernel(%arg0: i32, %arg1: memref<8x1xf32, #tpu.memory_space<vmem>>, %arg2: memref<1x17xf32, #tpu.memory_space<vmem>>, %arg3: memref<8x17xf32, #tpu.memory_space<vmem>>) attributes {dimension_semantics = [#tpu.dimension_semantics<parallel>], iteration_bounds = array<i64: 1>, scalar_prefetch = 0 : i64, scratch_operands = 0 : i64, tpu.core_type = #tpu.core_type<tc>, window_params = [{transform_indices = @transform_0, window_bounds = array<i64: 8, 1>}, {pipeline_mode = #tpu.pipeline_mode<synchronous>, transform_indices = @transform_1, window_bounds = array<i64: 1, 17>}, {transform_indices = @transform_2, window_bounds = array<i64: 8, 17>}]} {
    %c0 = arith.constant 0 : index
    %c0_0 = arith.constant 0 : index
    %0 = vector.load %arg1[%c0, %c0_0] : memref<8x1xf32, #tpu.memory_space<vmem>>, vector<8x1xf32>
    %c0_1 = arith.constant 0 : index
    %c0_2 = arith.constant 0 : index
    %1 = vector.load %arg2[%c0_1, %c0_2] : memref<1x17xf32, #tpu.memory_space<vmem>>, vector<1x17xf32>
    %2 = vector.broadcast %0 : vector<8x1xf32> to vector<8x17xf32>
    %3 = vector.broadcast %1 : vector<1x17xf32> to vector<8x17xf32>
    %4 = arith.mulf %2, %3 : vector<8x17xf32>
    %cst = arith.constant 6.28318548 : f32
    %5 = vector.broadcast %cst : f32 to vector<8x17xf32>
    %6 = arith.mulf %4, %5 : vector<8x17xf32>
    %7 = math.sin %6 : vector<8x17xf32>
    %8 = math.cos %6 : vector<8x17xf32>
    %9 = tpu.iota {dimensions = array<i32: 1>} : vector<8x17xi32>
    %c8_i32 = arith.constant 8 : i32
    %10 = vector.broadcast %c8_i32 : i32 to vector<8x17xi32>
    %11 = arith.cmpi sle, %9, %10 : vector<8x17xi32>
    %12 = arith.select %11, %7, %8 : vector<8x17xi1>, vector<8x17xf32>
    %c0_i32 = arith.constant 0 : i32
    %13 = vector.broadcast %c0_i32 : i32 to vector<8x17xi32>
    %14 = arith.cmpi eq, %9, %13 : vector<8x17xi32>
    %15 = vector.shape_cast %0 : vector<8x1xf32> to vector<8x1xf32>
    %16 = vector.broadcast %15 : vector<8x1xf32> to vector<8x17xf32>
    %17 = arith.select %14, %16, %12 : vector<8x17xi1>, vector<8x17xf32>
    %c0_3 = arith.constant 0 : index
    %c0_4 = arith.constant 0 : index
    %18 = vector.load %arg3[%c0_3, %c0_4] : memref<8x17xf32, #tpu.memory_space<vmem>>, vector<8x17xf32>
    tpu.vector_store %arg3[%c0_3, %c0_4], %17 {strides = array<i32>} : memref<8x17xf32, #tpu.memory_space<vmem>>, vector<8x17xf32>,
    return
  }
  func.func @transform_0(%arg0: i32) -> (i32, i32) {
    %c0_i32 = arith.constant 0 : i32
    %c0_i32_0 = arith.constant 0 : i32
    return %arg0, %c0_i32 : i32, i32
  }
  func.func @transform_1(%arg0: i32) -> (i32, i32) {
    %c0_i32 = arith.constant 0 : i32
    %c0_i32_0 = arith.constant 0 : i32
    %c0_i32_1 = arith.constant 0 : i32
    return %c0_i32, %c0_i32_0 : i32, i32
  }
  func.func @transform_2(%arg0: i32) -> (i32, i32) {
    %c0_i32 = arith.constant 0 : i32
    %c0_i32_0 = arith.constant 0 : i32
    return %arg0, %c0_i32 : i32, i32
  }
}

</mosaic_0001>

<bundles_post_ra>
// kernel: tpu_custom_call.1
= control target key start
LH: loop header
LB: loop body
LE: loop exit
PB: predicated region body
PF: predicated region fallthrough
CT: control target
= control target key end

     0   :  { %v306_v1 = vmov 0   ;;  %s373_s0 = inlined_call_operand.vmem [shape: f32[8,1], index: 0, kind: input, shape index: {}]   ;;  %s374_s1 = inlined_call_operand.vmem [shape: f32[1,17], index: 1, kind: input, shape index: {}]   ;;  %s375_s2 = inlined_call_operand.hbm [shape: f32[8,17], index: 2, kind: output, shape index: {}]  }
   0x1   :  { %v12_v0 = vld [vmem:[%s373_s0] sm:$0xff]  ;;  %277 = vset.pattern.permute.xlu0 %v306_v1 }
   0x2   :  { %16 = vperm.xlu0 %277, %v12_v0  }
   0x3   :  { %7 = vsyncpa [#allocation3], 0  ;;  %v256_v2 = vld [vmem:[%s374_s1] ss:$0 sm:$0xff]  ;;  %v307_v16 = vmov 683565275  }
   0x4   :  { %v308_v18 = vmov 2475754826   ;;  %v309_v21 = vmov 2131351028   ;;  %v310_v24 = vmov 2102212464  }
   0x5   :  { %v311_v27 = vmov 920167782   ;;  %v312_v30 = vmov 1326507024   ;;  %s313_s0 = smov [#allocation2]  }
   0x6   :  { %s248_s1 = sshll.u32 %s313_s0, 4  ;;  %s249_s1 = int_to_ptr.vmem [resolvable:$true] %s248_s1 }
   0x7   :  { %s282_s13 = scalar_lea.vmem %s249_s1, 128  ;;  %p287_p1 = scmp.lt.s32.totalorder %s249_s1, %s249_s1 }
   0x8   :  { %p283_p0 = scmp.ne.s32.totalorder %s249_s1, %s282_s13  ;;  %p288_p2 = scmp.lt.s32.totalorder %s282_s13, %s282_s13 }
   0xa   :  { %p289_p3 = por %p288_p2, %p287_p1 }
   0xc   :  { %p290_p4 = pnand %p289_p3, %p283_p0 }
  0x81   :  { %v335_v3 = vpop.permute.xlu0 %16 }
  0x82   :  { %v25_v4 = vmul.f32 %v256_v2, %v335_v3 }
  0x84   :  { %v338_v5 = vmul.f32 6.2831855, %v25_v4 }
  0x86   :  { %v30_v6 = vand.u32 2139095040, %v338_v5  ;;  %v27_v10 = vand.u32 2147483647, %v338_v5  ;;  %vm29_vm7 = vcmp.lt.s32.totalorder %v338_v5, 0 }
  0x88   :  { %v31_v7 = vshrl.u32 %v30_v6, 23  ;;  %v34_v13 = vand.u32 8388607, %v27_v10  ;;  %vm28_vm8 = vcmp.le.f32.partialorder %v27_v10, 0.7853982 }
  0x8a   :  { %v257_v8 = vadd.s32 4294967169, %v31_v7  ;;  %v35_v32 = vor.u32 8388608, %v34_v13 }
  0x8c   :  { %v37_v9 = vadd.s32 1, %v257_v8  ;;  %v75_v46 = vshll.u32 %v35_v32, 8 }
  0x8e   :  { %vm38_vm0 = vcmp.gt.s32.totalorder %v37_v9, 0 }
  0x8f   :  { %v39_v11 = vsel %vm38_vm0, %v37_v9, 0 }
  0x90   :  { %v41_v12 = vand.u32 31, %v39_v11  ;;  %v40_v15 = vshrl.u32 %v39_v11, 5 }
  0x92   :  { %v42_v14 = vsub.s32 32, %v41_v12  ;;  %v44_v17 = vshll.u32 %v307_v16, %v41_v12  ;;  %v47_v19 = vshll.u32 %v308_v18, %v41_v12  ;;  %v50_v23 = vshll.u32 %v309_v21, %v41_v12 }
  0x93   :  { %v53_v26 = vshll.u32 %v310_v24, %v41_v12  ;;  %v56_v29 = vshll.u32 %v311_v27, %v41_v12  ;;  %vm59_vm1 = vcmp.lt.s32.totalorder %v40_v15, 1  ;;  %vm62_vm2 = vcmp.lt.s32.totalorder %v40_v15, 4 }
  0x94   :  { %v45_v20 = vshrl.u32 %v308_v18, %v42_v14  ;;  %v48_v22 = vshrl.u32 %v309_v21, %v42_v14  ;;  %v51_v25 = vshrl.u32 %v310_v24, %v42_v14  ;;  %v54_v28 = vshrl.u32 %v311_v27, %v42_v14 }
  0x95   :  { %v57_v31 = vshrl.u32 %v312_v30, %v42_v14  ;;  %v43_v41 = vshrl.u32 %v307_v16, %v42_v14  ;;  %vm61_vm3 = vcmp.lt.s32.totalorder %v40_v15, 3  ;;  %vm60_vm4 = vcmp.lt.s32.totalorder %v40_v15, 2 }
  0x96   :  { %v46_v33 = vor.u32 %v45_v20, %v44_v17  ;;  %v49_v34 = vor.u32 %v48_v22, %v47_v19  ;;  %v52_v35 = vor.u32 %v51_v25, %v50_v23  ;;  %v55_v36 = vor.u32 %v54_v28, %v53_v26 }
  0x97   :  { %v58_v37 = vor.u32 %v57_v31, %v56_v29  ;;  %v234_v26 = vlaneseq }
  0x98   :  { %v64_v38 = vsel %vm62_vm2, %v52_v35, 2102212464  ;;  %v67_v39 = vsel %vm59_vm1, %v46_v33, %v49_v34  ;;  %v71_v40 = vsel %vm59_vm1, %v49_v34, %v52_v35  ;;  %v68_v42 = vsel %vm62_vm2, %v55_v36, 920167782 }
  0x99   :  { %v72_v43 = vsel %vm62_vm2, %v58_v37, 1326507024  ;;  %v69_v44 = vsel %vm61_vm3, %v52_v35, %v68_v42  ;;  %v63_v47 = vsel %vm59_vm1, %v43_v41, %v46_v33  ;;  %v65_v48 = vsel %vm61_vm3, %v49_v34, %v64_v38 }
  0x9a   :  { %v73_v45 = vsel %vm61_vm3, %v55_v36, %v72_v43  ;;  %v70_v49 = vsel %vm60_vm4, %v67_v39, %v69_v44  ;;  %v66_v55 = vsel %vm60_vm4, %v63_v47, %v65_v48  ;;  %v235_v28 = vand.u32 127, %v234_v26 }
  0x9b   :  { %v74_v50 = vsel %vm60_vm4, %v71_v40, %v73_v45  ;;  %v347_v53 = vmul.u32.u64.low %v75_v46, %v70_v49  ;;  %v348_v54 = vmul.u32.u64.high %v75_v46, %v70_v49, %v347_v53  ;;  %v82_v57 = vmul.u32 %v75_v46, %v66_v55 }
  0x9c   :  { %v344_v51 = vmul.u32.u64.low %v75_v46, %v74_v50  ;;  %v345_v52 = vmul.u32.u64.high %v75_v46, %v74_v50, %v344_v51  ;;  %vm236_vm9 = vcmp.le.s32.totalorder %v235_v28, 8  ;;  %vm238_vm0 = vcmp.eq.s32.totalorder %v235_v28, 0 }
  0x9d   :  { %v85_v56 = vadd.s32 1, %v348_v54  ;;  %vm119_vm1 = vweird.f32 %v338_v5  ;;  %vm240_vm2 = vcmask 138240  }
  0x9e   :  { %vm84_vm5 = vc.u32 %v345_v52, %v347_v53  ;;  %v83_v7 = vadd.s32 %v347_v53, %v345_v52 }
  0x9f   :  { %v86_v58 = vsel %vm84_vm5, %v85_v56, %v348_v54 }
  0xa0   :  { %v87_v59 = vadd.s32 %v86_v58, %v82_v57 }
  0xa2   :  { %v88_v60 = vadd.s32 536870912, %v87_v59 }
  0xa4   :  { %v89_v61 = vshrl.u32 %v88_v60, 30 }
  0xa6   :  { %v90_v62 = vshll.u32 %v89_v61, 30  ;;  %v113_v20 = vsub.s32 4, %v89_v61 }
  0xa8   :  { %v91_v63 = vsub.s32 %v87_v59, %v90_v62  ;;  %v114_v23 = vsel %vm29_vm7, %v113_v20, %v89_v61 }
  0xa9   :  { %v116_v25 = vsel %vm28_vm8, 0, %v114_v23 }
  0xaa   :  { %v93_v0 = vsub.s32 0, %v91_v63  ;;  %v120_v27 = vadd.s32 3, %v116_v25  ;;  %v224_v30 = vand.u32 3, %v116_v25 }
  0xac   :  { %v258_v1 = vmin.u32 %v93_v0, %v91_v63  ;;  %v121_v29 = vand.u32 3, %v120_v27  ;;  %vm229_vm11 = vcmp.eq.s32.totalorder %v224_v30, 2  ;;  %vm226_vm13 = vcmp.eq.s32.totalorder %v224_v30, 0 }
  0xad   :  { %vm225_vm15 = vcmp.lt.s32.totalorder %v224_v30, 2 }
  0xae   :  { %v95_v2 = vclz %v258_v1  ;;  %vm126_vm10 = vcmp.eq.s32.totalorder %v121_v29, 2  ;;  %vm123_vm12 = vcmp.eq.s32.totalorder %v121_v29, 0  ;;  %vm122_vm14 = vcmp.lt.s32.totalorder %v121_v29, 2 }
  0xb0   :  { %v259_v4 = vadd.s32 4294967294, %v95_v2 }
  0xb2   :  { %vm260_vm6 = vcmp.lt.s32.totalorder %v259_v4, 0 }
  0xb3   :  { %v98_v6 = vsel %vm260_vm6, 0, %v259_v4 }
  0xb4   :  { %v99_v8 = vsub.s32 32, %v98_v6  ;;  %v103_v9 = vsub.s32 4294967266, %v98_v6  ;;  %v100_v11 = vshll.u32 %v91_v63, %v98_v6 }
  0xb6   :  { %v101_v12 = vshrl.u32 %v83_v7, %v99_v8  ;;  %v104_v13 = vadd.s32 127, %v103_v9 }
  0xb8   :  { %v102_v14 = vor.u32 %v101_v12, %v100_v11  ;;  %v105_v15 = vshll.u32 %v104_v13, 23 }
  0xba   :  { %v106_v16 = vor.u32 4788187, %v105_v15  ;;  %v109_v18 = vcvt.s32.f32 %v102_v14 }
  0xbc   :  { %v107_v17 = vand.u32 2147483647, %v106_v16 }
  0xbe   :  { %v110_v19 = vmul.f32 %v109_v18, %v107_v17 }
  0xc0   :  { %v111_v21 = vxor.u32 2147483648, %v110_v19 }
  0xc2   :  { %v112_v22 = vsel %vm29_vm7, %v111_v21, %v110_v19 }
  0xc3   :  { %v115_v24 = vsel %vm28_vm8, %v338_v5, %v112_v22 }
  0xc4   :  { %278 = vcosq.f32 %v115_v24 }
  0xc5   :  { %280 = vsinq.f32 %v115_v24 }
  0xce   :  { %v279_v31 = vpop.eup %278 }
  0xcf   :  { %v281_v32 = vpop.eup %280  ;;  %v127_v33 = vxor.u32 2147483648, %v279_v31 }
  0xd0   :  { %v124_v34 = vxor.u32 2147483648, %v281_v32 }
  0xd1   :  { %v128_v10 = vsel %vm126_vm10, %v127_v33, %v281_v32  ;;  %v231_v35 = vsel %vm229_vm11, %v127_v33, %v281_v32 }
  0xd2   :  { %v125_v36 = vsel %vm123_vm12, %v279_v31, %v124_v34  ;;  %v228_v37 = vsel %vm226_vm13, %v279_v31, %v124_v34 }
  0xd3   :  { %v129_v38 = vsel %vm122_vm14, %v125_v36, %v128_v10  ;;  %v232_v39 = vsel %vm225_vm15, %v228_v37, %v231_v35 }
  0xd4   :  { %v130_v40 = vsel %vm119_vm1, nan, %v129_v38  ;;  %v233_v41 = vsel %vm119_vm1, nan, %v232_v39 }
  0xd5   :  { %v237_v42 = vsel %vm236_vm9, %v130_v40, %v233_v41 }
  0xd6   :  { %v239_v43 = vsel %vm238_vm0, %v335_v3, %v237_v42 }
  0xd7   :  { %241 = vst.msk [vmem:[#allocation2] sm:$0xff] %vm240_vm2, %v239_v43 }
  0xd8   :  { %293 = shalt.err (!%p290_p4)
}
  0xd9   :  { %s294_s16 = scalar_lea.hbm %s375_s2, 128 }
  0xda   :  { %p295_p5 = scmp.ne.s32.totalorder %s375_s2, %s294_s16  ;;  %p298_p6 = scmp.lt.u32.totalorder %s294_s16, %s375_s2 }
  0xdc   :  { %p300_p7 = pnand %p298_p6, %p295_p5 }
  0xde   :  { %303 = shalt.err (!%p300_p7)
}
  0xdf   :  { %251 = dma.vmem_to_hbm [thread:$0]  %s249_s1, 128, %s375_s2, [#allocation3]  }
  0xe0   :  { %304 = dma.done.wait [#allocation3], 128  }
  0xe1   :  { %305 = vsyncadd [#allocation3], 4294967168 }
  0xe2   :  { %255 = vsyncpa [#allocation3], 1 }

</bundles_post_ra>
